<compile_context>
chip_gen: v5e
topology: v5e:2x2
jax: 0.10.0
libtpu: 0.0.40
codegen_flags: <defaults>
</compile_context>

<pallas_src>
import functools

import jax
import jax.numpy as jnp
from jax import lax
from jax.experimental import pallas as pl
from jax.experimental.pallas import tpu as pltpu


def _embedding_kernel(z_ref, emb_ref, h_ref):
    """One row-tile of the embedding lookup.

    z_ref  : (TM, 1)   int32  node labels (-1 == padding)
    emb_ref: (S_pad, F) f32   embedding table (row 0 == label -1 / padding)
    h_ref  : (TM, F)   f32   output embeddings
    """
    tm = z_ref.shape[0]
    s_pad = emb_ref.shape[0]

    z = z_ref[...]                                   # (TM, 1) int32
    idx = z + 1                                      # padding (-1) -> row 0

    # Embedding gather as a one-hot selection matmul on the MXU.
    lanes = lax.broadcasted_iota(jnp.int32, (tm, s_pad), 1)
    onehot = (lanes == idx).astype(jnp.float32)      # (TM, S_pad)
    h = jnp.dot(onehot, emb_ref[...],
                preferred_element_type=jnp.float32)  # (TM, F)

    # mask = (z > -1).float(); zero out padded atoms.
    mask = (z > -1).astype(jnp.float32)              # (TM, 1), broadcasts over F
    h_ref[...] = (h * mask).astype(h_ref.dtype)


def molecular_embedding(z, r, emb_weight, *, block_rows=256):
    """JAX/Pallas equivalent of MolecularEmbedding.forward((z, r)).

    z          : (N, MA) int32 labels, -1 == padding
    r          : (N, MA, 3) coordinates (passed through unchanged)
    emb_weight : (n_species + 1, F) embedding table
    returns (z, r, h) with h : (N, MA, F)
    """
    n, ma = z.shape
    s, feat = emb_weight.shape

    rows = n * ma
    # Row tile: multiple of 128 (lane/MXU friendly), capped at block_rows.
    tm = min(block_rows, pl.cdiv(max(rows, 1), 128) * 128)
    rows_pad = pl.cdiv(rows, tm) * tm

    # Flatten & pad the label stream with -1 (padded rows embed to zero and
    # are sliced away afterwards).
    z_flat = jnp.full((rows_pad, 1), -1, dtype=jnp.int32)
    z_flat = z_flat.at[:rows, 0].set(z.reshape(-1).astype(jnp.int32))

    # Pad the species axis of the table to a multiple of 8 (sublane aligned);
    # padded rows are never selected (idx < s).
    s_pad = pl.cdiv(s, 8) * 8
    emb_pad = jnp.zeros((s_pad, feat), jnp.float32)
    emb_pad = emb_pad.at[:s, :].set(emb_weight.astype(jnp.float32))

    grid_spec = pltpu.PrefetchScalarGridSpec(
        num_scalar_prefetch=0,
        grid=(rows_pad // tm,),
        in_specs=[
            pl.BlockSpec((tm, 1), lambda i: (i, 0)),        # z tile
            pl.BlockSpec((s_pad, feat), lambda i: (0, 0)),  # table (resident)
        ],
        out_specs=pl.BlockSpec((tm, feat), lambda i: (i, 0)),
    )

    h_flat = pl.pallas_call(
        _embedding_kernel,
        out_shape=jax.ShapeDtypeStruct((rows_pad, feat), jnp.float32),
        grid_spec=grid_spec,
        compiler_params=pltpu.CompilerParams(
            dimension_semantics=("parallel",)),
    )(z_flat, emb_pad)

    h = h_flat[:rows].reshape(n, ma, feat)
    return z, r, h


def _reference(z, r, emb_weight):
    """Plain-JAX transcription of the PyTorch forward."""
    mask = (z > -1).astype(jnp.float32)[..., None]
    h = emb_weight[z + 1]            # padding (-1) -> row 0, zeroed by mask
    return z, r, h * mask


if __name__ == "__main__":
    key = jax.random.PRNGKey(0)
    n, ma, n_species, feat = 2, 16, 8, 32
    k1, k2, k3, k4 = jax.random.split(key, 4)

    r = jax.random.normal(k1, (n, ma, 3), jnp.float32) * 2.0
    # a few padded atoms (z == -1), otherwise labels in [0, n_species)
    z = jnp.where(jax.random.uniform(k2, (n, ma)) < 0.2,
                  -1,
                  jax.random.randint(k3, (n, ma), 0, n_species)).astype(jnp.int32)

    emb_weight = jax.random.normal(k4, (n_species + 1, feat), jnp.float32)

    z_o, r_o, h_o = molecular_embedding(z, r, emb_weight)
    h_o = jax.block_until_ready(h_o)

    _, _, h_ref = _reference(z, r, emb_weight)
    assert jnp.allclose(h_o, h_ref, rtol=1e-5, atol=1e-5), \
        float(jnp.max(jnp.abs(h_o - h_ref)))
    assert jnp.array_equal(z_o, z) and jnp.allclose(r_o, r)
    print("KERNEL_OK")
</pallas_src>

<mosaic_0001>
module attributes {stable_mosaic.version = 11 : i64} {
  func.func @_embedding_kernel(%arg0: i32, %arg1: memref<128x1xi32, #tpu.memory_space<vmem>>, %arg2: memref<16x32xf32, #tpu.memory_space<vmem>>, %arg3: memref<128x32xf32, #tpu.memory_space<vmem>>) attributes {dimension_semantics = [#tpu.dimension_semantics<parallel>], iteration_bounds = array<i64: 1>, scalar_prefetch = 0 : i64, scratch_operands = 0 : i64, tpu.core_type = #tpu.core_type<tc>, window_params = [{transform_indices = @transform_0, window_bounds = array<i64: 128, 1>}, {pipeline_mode = #tpu.pipeline_mode<synchronous>, transform_indices = @transform_1, window_bounds = array<i64: 16, 32>}, {transform_indices = @transform_2, window_bounds = array<i64: 128, 32>}]} {
    %c0 = arith.constant 0 : index
    %c0_0 = arith.constant 0 : index
    %0 = vector.load %arg1[%c0, %c0_0] : memref<128x1xi32, #tpu.memory_space<vmem>>, vector<128x1xi32>
    %c1_i32 = arith.constant 1 : i32
    %1 = vector.broadcast %c1_i32 : i32 to vector<128x1xi32>
    %2 = arith.addi %0, %1 : vector<128x1xi32>
    %3 = tpu.iota {dimensions = array<i32: 1>} : vector<128x16xi32>
    %4 = vector.broadcast %2 : vector<128x1xi32> to vector<128x16xi32>
    %5 = arith.cmpi eq, %3, %4 : vector<128x16xi32>
    %6 = arith.extui %5 : vector<128x16xi1> to vector<128x16xi32>
    %7 = arith.sitofp %6 : vector<128x16xi32> to vector<128x16xf32>
    %c0_1 = arith.constant 0 : index
    %c0_2 = arith.constant 0 : index
    %8 = vector.load %arg2[%c0_1, %c0_2] : memref<16x32xf32, #tpu.memory_space<vmem>>, vector<16x32xf32>
    %cst = arith.constant dense<0.000000e+00> : vector<128x32xf32>
    %9 = tpu.matmul %7, %8, %cst {dimension_numbers = #tpu.dot_dimension_numbers<[1], [0], [0], [1], [0, 0, 1, 1], [], []>} : vector<128x16xf32>, vector<16x32xf32>, vector<128x32xf32> -> vector<128x32xf32>
    %c-1_i32 = arith.constant -1 : i32
    %10 = vector.broadcast %c-1_i32 : i32 to vector<128x1xi32>
    %11 = arith.cmpi sgt, %0, %10 : vector<128x1xi32>
    %12 = arith.extui %11 : vector<128x1xi1> to vector<128x1xi32>
    %13 = arith.sitofp %12 : vector<128x1xi32> to vector<128x1xf32>
    %14 = vector.broadcast %13 : vector<128x1xf32> to vector<128x32xf32>
    %15 = arith.mulf %9, %14 : vector<128x32xf32>
    %c0_3 = arith.constant 0 : index
    %c0_4 = arith.constant 0 : index
    %16 = vector.load %arg3[%c0_3, %c0_4] : memref<128x32xf32, #tpu.memory_space<vmem>>, vector<128x32xf32>
    tpu.vector_store %arg3[%c0_3, %c0_4], %15 {strides = array<i32>} : memref<128x32xf32, #tpu.memory_space<vmem>>, vector<128x32xf32>,
    return
  }
  func.func @transform_0(%arg0: i32) -> (i32, i32) {
    %c0_i32 = arith.constant 0 : i32
    %c0_i32_0 = arith.constant 0 : i32
    return %arg0, %c0_i32 : i32, i32
  }
  func.func @transform_1(%arg0: i32) -> (i32, i32) {
    %c0_i32 = arith.constant 0 : i32
    %c0_i32_0 = arith.constant 0 : i32
    %c0_i32_1 = arith.constant 0 : i32
    return %c0_i32, %c0_i32_0 : i32, i32
  }
  func.func @transform_2(%arg0: i32) -> (i32, i32) {
    %c0_i32 = arith.constant 0 : i32
    %c0_i32_0 = arith.constant 0 : i32
    return %arg0, %c0_i32 : i32, i32
  }
}

</mosaic_0001>

<bundles_post_ra>
// kernel: tpu_custom_call.1
= control target key start
LH: loop header
LB: loop body
LE: loop exit
PB: predicated region body
PF: predicated region fallthrough
CT: control target
= control target key end

     0   :  { %v521_v0 = vmov 0   ;;  %v522_v31 = vmov 0.0   ;;  %v43_v61 = vlaneseq  ;;  %s746_s0 = inlined_call_operand.vmem [shape: s32[128,1], index: 0, kind: input, shape index: {}]   ;;  %s747_s1 = inlined_call_operand.vmem [shape: f32[16,32], index: 1, kind: input, shape index: {}]   ;;  %s748_s2 = inlined_call_operand.vmem [shape: f32[128,32], index: 2, kind: output, shape index: {}]  }
   0x1   :  { %480 = vset.pattern.permute.xlu2 %v521_v0  ;;  %479 = vset.pattern.permute.xlu1 %v521_v0  ;;  %v541_v1 = vld [vmem:[%s746_s0 + $0x48] sm:$0xff]  ;;  %v546_v2 = vld [vmem:[%s746_s0 + $0x40] sm:$0xff]  ;;  %v571_v13 = vld [vmem:[%s746_s0 + $0x50] sm:$0xff] }
   0x2   :  { %v11_v3 = vld [vmem:[%s746_s0] sm:$0xff]  ;;  %478 = vset.pattern.permute.xlu0 %v521_v0  ;;  %v36_v4 = vadd.s32 1, %v541_v1  ;;  %v35_v5 = vadd.s32 1, %v546_v2  ;;  %v556_v7 = vld [vmem:[%s746_s0 + $0x68] sm:$0xff]  ;;  %v37_v16 = vadd.s32 1, %v571_v13  ;;  %v17_v19 = vld [vmem:[%s746_s0 + $0x30] sm:$0xff] }
   0x3   :  { %v27_v6 = vadd.s32 1, %v11_v3  ;;  %v561_v8 = vld [vmem:[%s746_s0 + $0x60] sm:$0xff]  ;;  %v40_v10 = vadd.s32 1, %v556_v7  ;;  %v12_v14 = vld [vmem:[%s746_s0 + $0x8] sm:$0xff]  ;;  %v25_v20 = vld [vmem:[%s746_s0 + $0x70] sm:$0xff]  ;;  %v33_v22 = vadd.s32 1, %v17_v19 }
   0x4   :  { %73 = vperm.xlu2 %480, %v36_v4   ;;  %70 = vperm.xlu0 %478, %v35_v5   ;;  %v15_v9 = vld [vmem:[%s746_s0 + $0x20] sm:$0xff]  ;;  %v39_v11 = vadd.s32 1, %v561_v8  ;;  %v16_v15 = vld [vmem:[%s746_s0 + $0x28] sm:$0xff]  ;;  %v28_v17 = vadd.s32 1, %v12_v14  ;;  %v13_v21 = vld [vmem:[%s746_s0 + $0x10] sm:$0xff]  ;;  %v41_v23 = vadd.s32 1, %v25_v20 }
   0x5   :  { %46 = vperm.xlu1 %479, %v27_v6   ;;  %v31_v12 = vadd.s32 1, %v15_v9  ;;  %v32_v18 = vadd.s32 1, %v16_v15  ;;  %v29_v24 = vadd.s32 1, %v13_v21  ;;  %v14_v25 = vld [vmem:[%s746_s0 + $0x18] sm:$0xff]  ;;  %vm259_vm0 = vcmp.gt.s32.totalorder %v13_v21, 4294967295  ;;  %v142_v58 = vld [vmem:[%s747_s1 + $0x8] sm:$0xff] }
   0x6   :  { %v22_v26 = vld [vmem:[%s746_s0 + $0x58] sm:$0xff]  ;;  %v30_v28 = vadd.s32 1, %v14_v25  ;;  %vm260_vm1 = vcmp.gt.s32.totalorder %v14_v25, 4294967295  ;;  %vm257_vm2 = vcmp.gt.s32.totalorder %v11_v3, 4294967295  ;;  %vm258_vm3 = vcmp.gt.s32.totalorder %v12_v14, 4294967295  ;;  %206 = vmatpush.msra.mxu0 %v142_v58  ;;  %471 = vmatpush.msra.mxu2 %v142_v58  ;;  %v141_v59 = vld [vmem:[%s747_s1] sm:$0xff] }
   0x7   :  { %v26_v27 = vld [vmem:[%s746_s0 + $0x78] sm:$0xff]  ;;  %v38_v29 = vadd.s32 1, %v22_v26  ;;  %v456_v32 = vsel %vm259_vm0, 1.0, %v522_v31  ;;  %v457_v33 = vsel %vm260_vm1, 1.0, %v522_v31  ;;  %v454_v35 = vsel %vm257_vm2, 1.0, %v522_v31  ;;  %470 = vmatpush.msra.mxu1 %v142_v58  ;;  %472 = vmatpush.msra.mxu3 %v142_v58 }
   0x8   :  { %v42_v30 = vadd.s32 1, %v26_v27  ;;  %v18_v34 = vld [vmem:[%s746_s0 + $0x38] sm:$0xff]  ;;  %v455_v36 = vsel %vm258_vm3, 1.0, %v522_v31  ;;  %v486_v37 = vpack.i.bf16 %v457_v33, %v456_v32  ;;  %vm266_vm4 = vcmp.gt.s32.totalorder %v541_v1, 4294967295  ;;  %207 = vmatpush.msra.mxu0 %v141_v59  ;;  %474 = vmatpush.msra.mxu2 %v141_v59 }
   0x9   :  { %v34_v38 = vadd.s32 1, %v18_v34  ;;  %v481_v39 = vpack.i.bf16 %v455_v36, %v454_v35  ;;  %vm265_vm5 = vcmp.gt.s32.totalorder %v546_v2, 4294967295  ;;  %vm261_vm6 = vcmp.gt.s32.totalorder %v15_v9, 4294967295  ;;  %473 = vmatpush.msra.mxu1 %v141_v59  ;;  %475 = vmatpush.msra.mxu3 %v141_v59 }
   0xa   :  { %vm262_vm7 = vcmp.gt.s32.totalorder %v16_v15, 4294967295  ;;  %vm263_vm8 = vcmp.gt.s32.totalorder %v17_v19, 4294967295  ;;  %vm264_vm9 = vcmp.gt.s32.totalorder %v18_v34, 4294967295  ;;  %v463_v40 = vsel %vm266_vm4, 1.0, %v522_v31 }
   0xb   :  { %v462_v41 = vsel %vm265_vm5, 1.0, %v522_v31  ;;  %v458_v42 = vsel %vm261_vm6, 1.0, %v522_v31  ;;  %v459_v43 = vsel %vm262_vm7, 1.0, %v522_v31  ;;  %v460_v44 = vsel %vm263_vm8, 1.0, %v522_v31 }
   0xc   :  { %85 = vperm.xlu2 %480, %v40_v10   ;;  %82 = vperm.xlu0 %478, %v39_v11   ;;  %v461_v45 = vsel %vm264_vm9, 1.0, %v522_v31  ;;  %v501_v46 = vpack.i.bf16 %v463_v40, %v462_v41  ;;  %v491_v47 = vpack.i.bf16 %v459_v43, %v458_v42  ;;  %vm271_vm10 = vcmp.gt.s32.totalorder %v25_v20, 4294967295 }
   0xd   :  { %58 = vperm.xlu1 %479, %v31_v12   ;;  %v496_v48 = vpack.i.bf16 %v461_v45, %v460_v44  ;;  %vm272_vm11 = vcmp.gt.s32.totalorder %v26_v27, 4294967295  ;;  %vm267_vm12 = vcmp.gt.s32.totalorder %v571_v13, 4294967295  ;;  %vm268_vm13 = vcmp.gt.s32.totalorder %v22_v26, 4294967295 }
   0xe   :  { %vm269_vm14 = vcmp.gt.s32.totalorder %v561_v8, 4294967295  ;;  %vm270_vm15 = vcmp.gt.s32.totalorder %v556_v7, 4294967295  ;;  %v468_v49 = vsel %vm271_vm10, 1.0, %v522_v31  ;;  %v469_v50 = vsel %vm272_vm11, 1.0, %v522_v31 }
   0xf   :  { %v464_v51 = vsel %vm267_vm12, 1.0, %v522_v31  ;;  %v465_v52 = vsel %vm268_vm13, 1.0, %v522_v31  ;;  %v466_v53 = vsel %vm269_vm14, 1.0, %v522_v31  ;;  %v467_v54 = vsel %vm270_vm15, 1.0, %v522_v31 }
  0x10   :  { %v516_v55 = vpack.i.bf16 %v469_v50, %v468_v49  ;;  %v506_v56 = vpack.i.bf16 %v465_v52, %v464_v51  ;;  %v511_v57 = vpack.i.bf16 %v467_v54, %v466_v53  ;;  %v628_v62 = vand.u32 127, %v43_v61 }
  0x11   :  { %vm143_vm0 = vcmask 130048  }
  0x14   :  { %76 = vperm.xlu2 %480, %v37_v16   ;;  %49 = vperm.xlu0 %478, %v28_v17  }
  0x15   :  { %61 = vperm.xlu1 %479, %v32_v18  }
  0x1c   :  { %64 = vperm.xlu2 %480, %v33_v22   ;;  %88 = vperm.xlu0 %478, %v41_v23  }
  0x1d   :  { %52 = vperm.xlu1 %479, %v29_v24  }
  0x24   :  { %55 = vperm.xlu2 %480, %v30_v28   ;;  %79 = vperm.xlu0 %478, %v38_v29  }
  0x25   :  { %91 = vperm.xlu1 %479, %v42_v30  }
  0x2c   :  { %487 = vperm.xlu2 %480, %v486_v37   ;;  %67 = vperm.xlu0 %478, %v34_v38  }
  0x2d   :  { %482 = vperm.xlu1 %479, %v481_v39  }
  0x34   :  { %502 = vperm.xlu2 %480, %v501_v46   ;;  %492 = vperm.xlu0 %478, %v491_v47  }
  0x35   :  { %497 = vperm.xlu1 %479, %v496_v48  }
  0x3c   :  { %517 = vperm.xlu2 %480, %v516_v55   ;;  %507 = vperm.xlu0 %478, %v506_v56  }
  0x3d   :  { %512 = vperm.xlu1 %479, %v511_v57  }
  0x5e   :  { %v74_v60 = vpop.permute.xlu2 %73 }
  0x5f   :  { %vm102_vm3 = vcmp.eq.s32.totalorder %v628_v62, %v74_v60 }
  0x60   :  { %v431_v4 = vsel %vm102_vm3, 1.0, %v522_v31 }
  0x66   :  { %v86_v63 = vpop.permute.xlu2 %85 }
  0x67   :  { %vm106_vm7 = vcmp.eq.s32.totalorder %v628_v62, %v86_v63 }
  0x68   :  { %v435_v14 = vsel %vm106_vm7, 1.0, %v522_v31 }
  0x6e   :  { %v77_v6 = vpop.permute.xlu2 %76 }
  0x6f   :  { %vm103_vm6 = vcmp.eq.s32.totalorder %v628_v62, %v77_v6 }
  0x70   :  { %v432_v12 = vsel %vm103_vm6, 1.0, %v522_v31 }
  0x76   :  { %v71_v0 = vpop.permute.xlu0 %70  ;;  %v65_v15 = vpop.permute.xlu2 %64 }
  0x77   :  { %vm101_vm1 = vcmp.eq.s32.totalorder %v628_v62, %v71_v0  ;;  %v47_v1 = vpop.permute.xlu1 %46  ;;  %vm99_vm10 = vcmp.eq.s32.totalorder %v628_v62, %v65_v15 }
  0x78   :  { %v430_v2 = vsel %vm101_vm1, 1.0, %v522_v31  ;;  %vm93_vm2 = vcmp.eq.s32.totalorder %v628_v62, %v47_v1  ;;  %v428_v20 = vsel %vm99_vm10, 1.0, %v522_v31 }
  0x79   :  { %v422_v3 = vsel %vm93_vm2, 1.0, %v522_v31  ;;  %446 = vmatmul.msk.f32.vlgmr.msra.gmra.mxu2 %vm143_vm0, %v430_v2  ;;  %vm401_vm2 = vcmask 261120  }
  0x7a   :  { %438 = vmatmul.msk.f32.vlgmr.msra.gmra.mxu0 %vm143_vm0, %v422_v3 }
  0x7e   :  { %v83_v5 = vpop.permute.xlu0 %82  ;;  %v56_v22 = vpop.permute.xlu2 %55 }
  0x7f   :  { %vm105_vm4 = vcmp.eq.s32.totalorder %v628_v62, %v83_v5  ;;  %v59_v7 = vpop.permute.xlu1 %58  ;;  %vm96_vm13 = vcmp.eq.s32.totalorder %v628_v62, %v56_v22 }
  0x80   :  { %v434_v8 = vsel %vm105_vm4, 1.0, %v522_v31  ;;  %vm97_vm5 = vcmp.eq.s32.totalorder %v628_v62, %v59_v7  ;;  %v425_v26 = vsel %vm96_vm13, 1.0, %v522_v31 }
  0x81   :  { %v426_v9 = vsel %vm97_vm5, 1.0, %v522_v31  ;;  %447 = vmatmul.msk.f32.gmra.mxu2 %vm143_vm0, %v431_v4  ;;  %450 = vmatmul.msk.f32.vlgmr.msra.gmra.mxu3 %vm143_vm0, %v434_v8 }
  0x82   :  { %442 = vmatmul.msk.f32.vlgmr.msra.gmra.mxu1 %vm143_vm0, %v426_v9 }
  0x86   :  { %v50_v10 = vpop.permute.xlu0 %49  ;;  %v488_v32 = vpop.permute.xlu2 %487 }
  0x87   :  { %vm94_vm8 = vcmp.eq.s32.totalorder %v628_v62, %v50_v10  ;;  %v62_v11 = vpop.permute.xlu1 %61  ;;  %v489_v63 = vunpack.i.l.bf16 %v488_v32  ;;  %v490_v8 = vunpack.i.h.bf16 %v488_v32 }
  0x88   :  { %v423_v13 = vsel %vm94_vm8, 1.0, %v522_v31  ;;  %vm98_vm9 = vcmp.eq.s32.totalorder %v628_v62, %v62_v11 }
  0x89   :  { %v427_v16 = vsel %vm98_vm9, 1.0, %v522_v31  ;;  %439 = vmatmul.msk.f32.gmra.mxu0 %vm143_vm0, %v423_v13  ;;  %448 = vmatmul.msk.f32.gmra.mxu2 %vm143_vm0, %v432_v12 }
  0x8a   :  { %443 = vmatmul.msk.f32.gmra.mxu1 %vm143_vm0, %v427_v16  ;;  %451 = vmatmul.msk.f32.gmra.mxu3 %vm143_vm0, %v435_v14 }
  0x8e   :  { %v89_v17 = vpop.permute.xlu0 %88  ;;  %v503_v36 = vpop.permute.xlu2 %502 }
  0x8f   :  { %vm107_vm11 = vcmp.eq.s32.totalorder %v628_v62, %v89_v17  ;;  %v53_v18 = vpop.permute.xlu1 %52  ;;  %v504_v38 = vunpack.i.l.bf16 %v503_v36  ;;  %v505_v45 = vunpack.i.h.bf16 %v503_v36 }
  0x90   :  { %v436_v19 = vsel %vm107_vm11, 1.0, %v522_v31  ;;  %vm95_vm12 = vcmp.eq.s32.totalorder %v628_v62, %v53_v18 }
  0x91   :  { %v424_v21 = vsel %vm95_vm12, 1.0, %v522_v31 }
  0x92   :  { %440 = vmatmul.msk.f32.gmra.mxu0 %vm143_vm0, %v424_v21  ;;  %444 = vmatmul.msk.f32.gmra.mxu1 %vm143_vm0, %v428_v20 }
  0x93   :  { %452 = vmatmul.msk.f32.gmra.mxu3 %vm143_vm0, %v436_v19 }
  0x96   :  { %v80_v23 = vpop.permute.xlu0 %79  ;;  %v518_v6 = vpop.permute.xlu2 %517 }
  0x97   :  { %vm104_vm14 = vcmp.eq.s32.totalorder %v628_v62, %v80_v23  ;;  %v92_v24 = vpop.permute.xlu1 %91  ;;  %v519_v7 = vunpack.i.l.bf16 %v518_v6  ;;  %v520_v15 = vunpack.i.h.bf16 %v518_v6 }
  0x98   :  { %v433_v25 = vsel %vm104_vm14, 1.0, %v522_v31  ;;  %vm108_vm15 = vcmp.eq.s32.totalorder %v628_v62, %v92_v24 }
  0x99   :  { %v437_v27 = vsel %vm108_vm15, 1.0, %v522_v31  ;;  %449 = vmatmul.msk.f32.gmra.mxu2 %vm143_vm0, %v433_v25 }
  0x9a   :  { %441 = vmatmul.msk.f32.gmra.mxu0 %vm143_vm0, %v425_v26 }
  0x9b   :  { %453 = vmatmul.msk.f32.gmra.mxu3 %vm143_vm0, %v437_v27 }
  0x9e   :  { %v68_v28 = vpop.permute.xlu0 %67 }
  0x9f   :  { %vm100_vm1 = vcmp.eq.s32.totalorder %v628_v62, %v68_v28  ;;  %v483_v30 = vpop.permute.xlu1 %482 }
  0xa0   :  { %v429_v29 = vsel %vm100_vm1, 1.0, %v522_v31  ;;  %v484_v33 = vunpack.i.l.bf16 %v483_v30  ;;  %v485_v49 = vunpack.i.h.bf16 %v483_v30 }
  0xa1   :  { %445 = vmatmul.msk.f32.gmra.mxu1 %vm143_vm0, %v429_v29 }
  0xa6   :  { %v493_v39 = vpop.permute.xlu0 %492 }
  0xa7   :  { %v678_v34 = vpop.permute.xlu1 %497  ;;  %v494_v41 = vunpack.i.l.bf16 %v493_v39  ;;  %v495_v52 = vunpack.i.h.bf16 %v493_v39 }
  0xa8   :  { %v499_v0 = vunpack.i.l.bf16 %v678_v34  ;;  %v500_v16 = vunpack.i.h.bf16 %v678_v34 }
  0xae   :  { %v508_v56 = vpop.permute.xlu0 %507 }
  0xaf   :  { %v513_v43 = vpop.permute.xlu1 %512  ;;  %v509_v58 = vunpack.i.l.bf16 %v508_v56  ;;  %v510_v13 = vunpack.i.h.bf16 %v508_v56 }
  0xb0   :  { %v514_v46 = vunpack.i.l.bf16 %v513_v43  ;;  %v515_v59 = vunpack.i.h.bf16 %v513_v43 }
  0xf7   :  { %v209_v35 = vpop.f32.mrf.mxu0 }
  0xf8   :  { %v385_v37 = vmul.f32 %v484_v33, %v209_v35 }
  0xfa   :  { %402 = vst.msk [vmem:[%s748_s2] sm:$0xff] %vm401_vm2, %v385_v37 }
  0xfc   :  { %v233_v40 = vpop.f32.mrf.mxu2 }
  0xfd   :  { %v393_v31 = vmul.f32 %v504_v38, %v233_v40 }
  0xff   :  { %410 = vst.msk [vmem:[%s748_s2 + $0x40] sm:$0xff] %vm401_vm2, %v393_v31  ;;  %v221_v42 = vpop.f32.mrf.mxu1 }
 0x100   :  { %v389_v44 = vmul.f32 %v494_v41, %v221_v42 }
 0x102   :  { %406 = vst.msk [vmem:[%s748_s2 + $0x20] sm:$0xff] %vm401_vm2, %v389_v44 }
 0x104   :  { %v236_v47 = vpop.f32.mrf.mxu2  ;;  %v245_v48 = vpop.f32.mrf.mxu3 }
 0x105   :  { %v394_v50 = vmul.f32 %v505_v45, %v236_v47  ;;  %v397_v51 = vmul.f32 %v514_v46, %v245_v48 }
 0x106   :  { %v212_v53 = vpop.f32.mrf.mxu0 }
 0x107   :  { %411 = vst.msk [vmem:[%s748_s2 + $0x48] sm:$0xff] %vm401_vm2, %v394_v50  ;;  %v386_v54 = vmul.f32 %v485_v49, %v212_v53  ;;  %v224_v55 = vpop.f32.mrf.mxu1 }
 0x108   :  { %414 = vst.msk [vmem:[%s748_s2 + $0x60] sm:$0xff] %vm401_vm2, %v397_v51  ;;  %v390_v57 = vmul.f32 %v495_v52, %v224_v55 }
 0x109   :  { %403 = vst.msk [vmem:[%s748_s2 + $0x8] sm:$0xff] %vm401_vm2, %v386_v54 }
 0x10a   :  { %407 = vst.msk [vmem:[%s748_s2 + $0x28] sm:$0xff] %vm401_vm2, %v390_v57 }
 0x10c   :  { %v239_v60 = vpop.f32.mrf.mxu2 }
 0x10d   :  { %v395_v61 = vmul.f32 %v509_v58, %v239_v60  ;;  %v248_v62 = vpop.f32.mrf.mxu3 }
 0x10e   :  { %v398_v1 = vmul.f32 %v515_v59, %v248_v62 }
 0x10f   :  { %412 = vst.msk [vmem:[%s748_s2 + $0x50] sm:$0xff] %vm401_vm2, %v395_v61  ;;  %v215_v2 = vpop.f32.mrf.mxu0  ;;  %v227_v3 = vpop.f32.mrf.mxu1 }
 0x110   :  { %415 = vst.msk [vmem:[%s748_s2 + $0x68] sm:$0xff] %vm401_vm2, %v398_v1  ;;  %v387_v4 = vmul.f32 %v489_v63, %v215_v2  ;;  %v391_v5 = vmul.f32 %v499_v0, %v227_v3 }
 0x112   :  { %404 = vst.msk [vmem:[%s748_s2 + $0x10] sm:$0xff] %vm401_vm2, %v387_v4 }
 0x113   :  { %408 = vst.msk [vmem:[%s748_s2 + $0x30] sm:$0xff] %vm401_vm2, %v391_v5 }
 0x116   :  { %v251_v9 = vpop.f32.mrf.mxu3 }
 0x117   :  { %v399_v10 = vmul.f32 %v519_v7, %v251_v9  ;;  %v218_v11 = vpop.f32.mrf.mxu0 }
 0x118   :  { %v388_v12 = vmul.f32 %v490_v8, %v218_v11 }
 0x119   :  { %416 = vst.msk [vmem:[%s748_s2 + $0x70] sm:$0xff] %vm401_vm2, %v399_v10 }
 0x11a   :  { %405 = vst.msk [vmem:[%s748_s2 + $0x18] sm:$0xff] %vm401_vm2, %v388_v12 }
 0x11c   :  { %v242_v14 = vpop.f32.mrf.mxu2 }
 0x11d   :  { %v396_v17 = vmul.f32 %v510_v13, %v242_v14 }
 0x11e   :  { %v254_v18 = vpop.f32.mrf.mxu3  ;;  %v230_v19 = vpop.f32.mrf.mxu1 }
 0x11f   :  { %413 = vst.msk [vmem:[%s748_s2 + $0x58] sm:$0xff] %vm401_vm2, %v396_v17  ;;  %v400_v20 = vmul.f32 %v520_v15, %v254_v18  ;;  %v392_v21 = vmul.f32 %v500_v16, %v230_v19 }
 0x121   :  { %417 = vst.msk [vmem:[%s748_s2 + $0x78] sm:$0xff] %vm401_vm2, %v400_v20 }
 0x122   :  { %409 = vst.msk [vmem:[%s748_s2 + $0x38] sm:$0xff] %vm401_vm2, %v392_v21 }

</bundles_post_ra>
